<compile_context>
chip_gen: v5e
topology: v5e:2x2
jax: 0.10.0
libtpu: 0.0.40
codegen_flags: <defaults>
</compile_context>

<pallas_src>
import jax
import jax.numpy as jnp
import numpy as np
from jax import lax
from jax.experimental import pallas as pl
from jax.experimental.pallas import tpu as pltpu


def make_attention_kernel(num_heads: int):
    def kernel(x_ref, wq_ref, wk_ref, wv_ref, wp_ref, bp_ref, o_ref, acc_ref):
        h = pl.program_id(1)

        @pl.when(h == 0)
        def _init():
            acc_ref[...] = jnp.zeros_like(acc_ref)

        dtype = x_ref.dtype
        x = x_ref[0]            # (N, C)   input dtype, no forced f32 upcast
        wq = wq_ref[0]          # (C, hd)  already multiplied by `scale`
        wk = wk_ref[0]          # (C, hd)
        wv = wv_ref[0]          # (C, hd)
        wp = wp_ref[0]          # (hd, C)  this head's slice of the output projection

        # Per-head q/k/v projections; MXU with f32 accumulation.
        q = jnp.dot(x, wq, preferred_element_type=jnp.float32).astype(dtype)
        k = jnp.dot(x, wk, preferred_element_type=jnp.float32).astype(dtype)
        v = jnp.dot(x, wv, preferred_element_type=jnp.float32).astype(dtype)

        # Scores: contract head_dim of q with head_dim of k (no in-kernel k.T).
        s = lax.dot_general(q, k, (((1,), (1,)), ((), ())),
                            preferred_element_type=jnp.float32)      # (N, N) f32

        # Softmax in f32; normalization via the otherwise-idle EUP reciprocal.
        s = s - jnp.max(s, axis=-1, keepdims=True)
        p = jnp.exp(s)
        p = p * pl.reciprocal(jnp.sum(p, axis=-1, keepdims=True), approx=True)

        # P @ V for this head, then accumulate this head's rank-hd update of the
        # output projection into the f32 scratch.
        o_h = jnp.dot(p.astype(dtype), v,
                      preferred_element_type=jnp.float32).astype(dtype)   # (N, hd)
        acc_ref[...] += jnp.dot(o_h, wp, preferred_element_type=jnp.float32)

        @pl.when(h == num_heads - 1)
        def _finalize():
            out = acc_ref[...] + bp_ref[...].astype(jnp.float32)
            o_ref[0] = out.astype(o_ref.dtype)

    return kernel


def attention_forward(x, w_qkv, w_proj, b_proj, *, num_heads):
    """x: (B, N, C); w_qkv: (3C, C); w_proj: (C, C); b_proj: (C,) (PyTorch layouts)."""
    B, N, C = x.shape
    head_dim = C // num_heads
    scale = head_dim ** (-0.5)
    dtype = x.dtype

    # One-time weight preparation (outside the kernel):
    #   per-head (C, hd) q/k/v weights with the softmax scale folded into Wq,
    #   per-head (hd, C) slices of the (transposed) output projection, (1, C) bias.
    def split_heads(w):                                   # w: (C_out, C_in)
        return w.reshape(num_heads, head_dim, C).transpose(0, 2, 1)   # (H, C, hd)

    wq_h = (split_heads(w_qkv[0 * C:1 * C]) * scale).astype(dtype)
    wk_h = split_heads(w_qkv[1 * C:2 * C]).astype(dtype)
    wv_h = split_heads(w_qkv[2 * C:3 * C]).astype(dtype)
    wp_h = jnp.transpose(w_proj).reshape(num_heads, head_dim, C).astype(dtype)
    bp = b_proj.reshape(1, C).astype(dtype)

    # Explicit VMEM budget: x/out double-buffered, per-head weights double-buffered,
    # f32 accumulator + score/qkv temporaries; 2x headroom, capped at 48 MiB (v7x).
    isz = jnp.dtype(dtype).itemsize
    est = (2 * 2 * N * C * isz                                   # x + out blocks
           + 2 * (3 * C * head_dim + head_dim * C + C) * isz     # weights + bias
           + N * C * 4                                           # f32 accumulator
           + (N * N + 4 * N * head_dim) * 4)                     # scores + q/k/v/o
    vmem_limit = int(min(max(2 * est + (4 << 20), 32 << 20), 48 << 20))

    kernel = make_attention_kernel(num_heads)

    return pl.pallas_call(
        kernel,
        out_shape=jax.ShapeDtypeStruct((B, N, C), dtype),
        grid_spec=pltpu.PrefetchScalarGridSpec(
            num_scalar_prefetch=0,
            grid=(B, num_heads),
            in_specs=[
                pl.BlockSpec((1, N, C), lambda b, h: (b, 0, 0)),          # x (resident across h)
                pl.BlockSpec((1, C, head_dim), lambda b, h: (h, 0, 0)),   # Wq (pre-scaled)
                pl.BlockSpec((1, C, head_dim), lambda b, h: (h, 0, 0)),   # Wk
                pl.BlockSpec((1, C, head_dim), lambda b, h: (h, 0, 0)),   # Wv
                pl.BlockSpec((1, head_dim, C), lambda b, h: (h, 0, 0)),   # Wproj slice
                pl.BlockSpec((1, C), lambda b, h: (0, 0)),                # proj bias
            ],
            out_specs=pl.BlockSpec((1, N, C), lambda b, h: (b, 0, 0)),
            scratch_shapes=[pltpu.VMEM((N, C), jnp.float32)],
        ),
        compiler_params=pltpu.CompilerParams(
            dimension_semantics=("parallel", "arbitrary"),
            vmem_limit_bytes=vmem_limit,
        ),
    )(x, wq_h, wk_h, wv_h, wp_h, bp)


def attention_reference(x, w_qkv, w_proj, b_proj, *, num_heads):
    """Pure-JAX reference mirroring the PyTorch forward exactly."""
    B, N, C = x.shape
    head_dim = C // num_heads
    scale = head_dim ** (-0.5)
    qkv = jnp.einsum('bnc,oc->bno', x, w_qkv)                        # (B, N, 3C)
    qkv = qkv.reshape(B, N, 3, num_heads, head_dim).transpose(2, 0, 3, 1, 4)
    q, k, v = qkv[0], qkv[1], qkv[2]                                 # (B, H, N, hd)
    attn = jnp.einsum('bhnd,bhmd->bhnm', q, k) * scale
    attn = jax.nn.softmax(attn, axis=-1)
    out = jnp.einsum('bhnm,bhmd->bhnd', attn, v)
    out = out.transpose(0, 2, 1, 3).reshape(B, N, C)
    out = jnp.einsum('bnc,oc->bno', out, w_proj) + b_proj
    return out


if __name__ == "__main__":
    # Small shapes consistent with the module: B=2 batches, N=16 tokens,
    # C=32 channels, 8 heads (head_dim=4).  qkv_bias=False (default).
    B, N, C = 2, 16, 32
    num_heads = 8

    key = jax.random.PRNGKey(0)
    kx, kq, kp, kb = jax.random.split(key, 4)

    x = jax.random.normal(kx, (B, N, C), dtype=jnp.float32)
    # Deterministic parameter init (PyTorch-style (out, in) weight layout).
    w_qkv = jax.random.normal(kq, (3 * C, C), dtype=jnp.float32) * 0.05
    w_proj = jax.random.normal(kp, (C, C), dtype=jnp.float32) * 0.05
    b_proj = jax.random.normal(kb, (C,), dtype=jnp.float32) * 0.05

    out = attention_forward(x, w_qkv, w_proj, b_proj, num_heads=num_heads)
    out = jax.block_until_ready(out)

    ref = attention_reference(x, w_qkv, w_proj, b_proj, num_heads=num_heads)
    # Slightly relaxed tolerance: softmax normalization uses the approximate EUP
    # reciprocal (relative error ~1e-4).
    np.testing.assert_allclose(np.asarray(out), np.asarray(ref),
                               rtol=2e-3, atol=2e-3)

    print("KERNEL_OK")
</pallas_src>

<mosaic_0001>
module attributes {stable_mosaic.version = 11 : i64} {
  func.func @kernel(%arg0: i32, %arg1: i32, %arg2: memref<1x16x32xf32, #tpu.memory_space<vmem>>, %arg3: memref<1x32x4xf32, #tpu.memory_space<vmem>>, %arg4: memref<1x32x4xf32, #tpu.memory_space<vmem>>, %arg5: memref<1x32x4xf32, #tpu.memory_space<vmem>>, %arg6: memref<1x4x32xf32, #tpu.memory_space<vmem>>, %arg7: memref<1x32xf32, #tpu.memory_space<vmem>>, %arg8: memref<1x16x32xf32, #tpu.memory_space<vmem>>, %arg9: memref<16x32xf32, #tpu.memory_space<vmem>>) attributes {dimension_semantics = [#tpu.dimension_semantics<parallel>, #tpu.dimension_semantics<arbitrary>], iteration_bounds = array<i64: 2, 8>, scalar_prefetch = 0 : i64, scratch_operands = 1 : i64, tpu.core_type = #tpu.core_type<tc>, window_params = [{transform_indices = @transform_0, window_bounds = array<i64: 1, 16, 32>}, {transform_indices = @transform_1, window_bounds = array<i64: 1, 32, 4>}, {transform_indices = @transform_2, window_bounds = array<i64: 1, 32, 4>}, {transform_indices = @transform_3, window_bounds = array<i64: 1, 32, 4>}, {transform_indices = @transform_4, window_bounds = array<i64: 1, 4, 32>}, {pipeline_mode = #tpu.pipeline_mode<synchronous>, transform_indices = @transform_5, window_bounds = array<i64: 1, 32>}, {transform_indices = @transform_6, window_bounds = array<i64: 1, 16, 32>}]} {
    %c0_i32 = arith.constant 0 : i32
    %0 = arith.cmpi eq, %arg1, %c0_i32 : i32
    %1 = arith.extui %0 : i1 to i32
    %c0_i32_0 = arith.constant 0 : i32
    %2 = arith.cmpi ne, %1, %c0_i32_0 : i32
    scf.if %2 {
      %cst_27 = arith.constant 0.000000e+00 : f32
      %35 = vector.broadcast %cst_27 : f32 to vector<16x32xf32>
      %c0_28 = arith.constant 0 : index
      %c0_29 = arith.constant 0 : index
      %36 = vector.load %arg9[%c0_28, %c0_29] : memref<16x32xf32, #tpu.memory_space<vmem>>, vector<16x32xf32>
      tpu.vector_store %arg9[%c0_28, %c0_29], %35 {strides = array<i32>} : memref<16x32xf32, #tpu.memory_space<vmem>>, vector<16x32xf32>,
    } else {
    }
    %c0 = arith.constant 0 : index
    %c0_1 = arith.constant 0 : index
    %c0_2 = arith.constant 0 : index
    %3 = vector.load %arg2[%c0, %c0_1, %c0_2] : memref<1x16x32xf32, #tpu.memory_space<vmem>>, vector<1x16x32xf32>
    %4 = vector.shape_cast %3 : vector<1x16x32xf32> to vector<16x32xf32>
    %c0_3 = arith.constant 0 : index
    %c0_4 = arith.constant 0 : index
    %c0_5 = arith.constant 0 : index
    %5 = vector.load %arg3[%c0_3, %c0_4, %c0_5] : memref<1x32x4xf32, #tpu.memory_space<vmem>>, vector<1x32x4xf32>
    %6 = vector.shape_cast %5 : vector<1x32x4xf32> to vector<32x4xf32>
    %c0_6 = arith.constant 0 : index
    %c0_7 = arith.constant 0 : index
    %c0_8 = arith.constant 0 : index
    %7 = vector.load %arg4[%c0_6, %c0_7, %c0_8] : memref<1x32x4xf32, #tpu.memory_space<vmem>>, vector<1x32x4xf32>
    %8 = vector.shape_cast %7 : vector<1x32x4xf32> to vector<32x4xf32>
    %c0_9 = arith.constant 0 : index
    %c0_10 = arith.constant 0 : index
    %c0_11 = arith.constant 0 : index
    %9 = vector.load %arg5[%c0_9, %c0_10, %c0_11] : memref<1x32x4xf32, #tpu.memory_space<vmem>>, vector<1x32x4xf32>
    %10 = vector.shape_cast %9 : vector<1x32x4xf32> to vector<32x4xf32>
    %c0_12 = arith.constant 0 : index
    %c0_13 = arith.constant 0 : index
    %c0_14 = arith.constant 0 : index
    %11 = vector.load %arg6[%c0_12, %c0_13, %c0_14] : memref<1x4x32xf32, #tpu.memory_space<vmem>>, vector<1x4x32xf32>
    %12 = vector.shape_cast %11 : vector<1x4x32xf32> to vector<4x32xf32>
    %cst = arith.constant dense<0.000000e+00> : vector<16x4xf32>
    %13 = tpu.matmul %4, %6, %cst {dimension_numbers = #tpu.dot_dimension_numbers<[1], [0], [0], [1], [0, 0, 1, 1], [], []>} : vector<16x32xf32>, vector<32x4xf32>, vector<16x4xf32> -> vector<16x4xf32>
    %cst_15 = arith.constant dense<0.000000e+00> : vector<16x4xf32>
    %14 = tpu.matmul %4, %8, %cst_15 {dimension_numbers = #tpu.dot_dimension_numbers<[1], [0], [0], [1], [0, 0, 1, 1], [], []>} : vector<16x32xf32>, vector<32x4xf32>, vector<16x4xf32> -> vector<16x4xf32>
    %cst_16 = arith.constant dense<0.000000e+00> : vector<16x4xf32>
    %15 = tpu.matmul %4, %10, %cst_16 {dimension_numbers = #tpu.dot_dimension_numbers<[1], [0], [0], [1], [0, 0, 1, 1], [], []>} : vector<16x32xf32>, vector<32x4xf32>, vector<16x4xf32> -> vector<16x4xf32>
    %cst_17 = arith.constant dense<0.000000e+00> : vector<16x16xf32>
    %16 = tpu.matmul %13, %14, %cst_17 {dimension_numbers = #tpu.dot_dimension_numbers<[1], [1], [0], [0], [0, 0, 1, 0], [], []>} : vector<16x4xf32>, vector<16x4xf32>, vector<16x16xf32> -> vector<16x16xf32>
    %cst_18 = arith.constant dense<0xFF800000> : vector<16xf32>
    %17 = vector.multi_reduction <maximumf>, %16, %cst_18 [1] : vector<16x16xf32> to vector<16xf32>
    %18 = vector.shape_cast %17 : vector<16xf32> to vector<16x1xf32>
    %19 = vector.broadcast %18 : vector<16x1xf32> to vector<16x16xf32>
    %20 = arith.subf %16, %19 : vector<16x16xf32>
    %21 = math.exp %20 : vector<16x16xf32>
    %cst_19 = arith.constant dense<0.000000e+00> : vector<16xf32>
    %22 = vector.multi_reduction <add>, %21, %cst_19 [1] : vector<16x16xf32> to vector<16xf32>
    %23 = vector.shape_cast %22 : vector<16xf32> to vector<16x1xf32>
    %24 = tpu.reciprocal %23 {approx = true} : vector<16x1xf32> -> vector<16x1xf32>
    %25 = vector.broadcast %24 : vector<16x1xf32> to vector<16x16xf32>
    %26 = arith.mulf %21, %25 : vector<16x16xf32>
    %cst_20 = arith.constant dense<0.000000e+00> : vector<16x4xf32>
    %27 = tpu.matmul %26, %15, %cst_20 {dimension_numbers = #tpu.dot_dimension_numbers<[1], [0], [0], [1], [0, 0, 1, 1], [], []>} : vector<16x16xf32>, vector<16x4xf32>, vector<16x4xf32> -> vector<16x4xf32>
    %c0_21 = arith.constant 0 : index
    %c0_22 = arith.constant 0 : index
    %28 = vector.load %arg9[%c0_21, %c0_22] : memref<16x32xf32, #tpu.memory_space<vmem>>, vector<16x32xf32>
    %cst_23 = arith.constant dense<0.000000e+00> : vector<16x32xf32>
    %29 = tpu.matmul %27, %12, %cst_23 {dimension_numbers = #tpu.dot_dimension_numbers<[1], [0], [0], [1], [0, 0, 1, 1], [], []>} : vector<16x4xf32>, vector<4x32xf32>, vector<16x32xf32> -> vector<16x32xf32>
    %30 = arith.addf %28, %29 : vector<16x32xf32>
    %c0_24 = arith.constant 0 : index
    %c0_25 = arith.constant 0 : index
    %31 = vector.load %arg9[%c0_24, %c0_25] : memref<16x32xf32, #tpu.memory_space<vmem>>, vector<16x32xf32>
    tpu.vector_store %arg9[%c0_24, %c0_25], %30 {strides = array<i32>} : memref<16x32xf32, #tpu.memory_space<vmem>>, vector<16x32xf32>,
    %c7_i32 = arith.constant 7 : i32
    %32 = arith.cmpi eq, %arg1, %c7_i32 : i32
    %33 = arith.extui %32 : i1 to i32
    %c0_i32_26 = arith.constant 0 : i32
    %34 = arith.cmpi ne, %33, %c0_i32_26 : i32
    scf.if %34 {
      %c0_27 = arith.constant 0 : index
      %c0_28 = arith.constant 0 : index
      %35 = vector.load %arg9[%c0_27, %c0_28] : memref<16x32xf32, #tpu.memory_space<vmem>>, vector<16x32xf32>
      %c0_29 = arith.constant 0 : index
      %c0_30 = arith.constant 0 : index
      %36 = vector.load %arg7[%c0_29, %c0_30] : memref<1x32xf32, #tpu.memory_space<vmem>>, vector<1x32xf32>
      %37 = vector.broadcast %36 : vector<1x32xf32> to vector<16x32xf32>
      %38 = arith.addf %35, %37 : vector<16x32xf32>
      %c0_31 = arith.constant 0 : index
      %c0_32 = arith.constant 0 : index
      %c0_33 = arith.constant 0 : index
      %39 = vector.load %arg8[%c0_31, %c0_32, %c0_33] : memref<1x16x32xf32, #tpu.memory_space<vmem>>, vector<1x16x32xf32>
      %40 = vector.shape_cast %39 : vector<1x16x32xf32> to vector<16x32xf32>
      %41 = vector.shape_cast %38 : vector<16x32xf32> to vector<1x16x32xf32>
      tpu.vector_store %arg8[%c0_31, %c0_32, %c0_33], %41 {strides = array<i32>} : memref<1x16x32xf32, #tpu.memory_space<vmem>>, vector<1x16x32xf32>,
    } else {
    }
    return
  }
  func.func @transform_0(%arg0: i32, %arg1: i32) -> (i32, i32, i32) {
    %c0_i32 = arith.constant 0 : i32
    %c0_i32_0 = arith.constant 0 : i32
    %c0_i32_1 = arith.constant 0 : i32
    return %arg0, %c0_i32, %c0_i32_0 : i32, i32, i32
  }
  func.func @transform_1(%arg0: i32, %arg1: i32) -> (i32, i32, i32) {
    %c0_i32 = arith.constant 0 : i32
    %c0_i32_0 = arith.constant 0 : i32
    %c0_i32_1 = arith.constant 0 : i32
    return %arg1, %c0_i32, %c0_i32_0 : i32, i32, i32
  }
  func.func @transform_2(%arg0: i32, %arg1: i32) -> (i32, i32, i32) {
    %c0_i32 = arith.constant 0 : i32
    %c0_i32_0 = arith.constant 0 : i32
    %c0_i32_1 = arith.constant 0 : i32
    return %arg1, %c0_i32, %c0_i32_0 : i32, i32, i32
  }
  func.func @transform_3(%arg0: i32, %arg1: i32) -> (i32, i32, i32) {
    %c0_i32 = arith.constant 0 : i32
    %c0_i32_0 = arith.constant 0 : i32
    %c0_i32_1 = arith.constant 0 : i32
    return %arg1, %c0_i32, %c0_i32_0 : i32, i32, i32
  }
  func.func @transform_4(%arg0: i32, %arg1: i32) -> (i32, i32, i32) {
    %c0_i32 = arith.constant 0 : i32
    %c0_i32_0 = arith.constant 0 : i32
    %c0_i32_1 = arith.constant 0 : i32
    return %arg1, %c0_i32, %c0_i32_0 : i32, i32, i32
  }
  func.func @transform_5(%arg0: i32, %arg1: i32) -> (i32, i32) {
    %c0_i32 = arith.constant 0 : i32
    %c0_i32_0 = arith.constant 0 : i32
    %c0_i32_1 = arith.constant 0 : i32
    return %c0_i32, %c0_i32_0 : i32, i32
  }
  func.func @transform_6(%arg0: i32, %arg1: i32) -> (i32, i32, i32) {
    %c0_i32 = arith.constant 0 : i32
    %c0_i32_0 = arith.constant 0 : i32
    %c0_i32_1 = arith.constant 0 : i32
    return %arg0, %c0_i32, %c0_i32_0 : i32, i32, i32
  }
}

</mosaic_0001>

<bundles_post_ra>
// kernel: tpu_custom_call.1
= control target key start
LH: loop header
LB: loop body
LE: loop exit
PB: predicated region body
PF: predicated region fallthrough
CT: control target
= control target key end

     0   :  { %11 = vsyncpa [#allocation4], 0  ;;  %s1168_s0 = inlined_call_operand.vmem [shape: f32[2,16,32], index: 0, kind: input, shape index: {}]   ;;  %s1169_s1 = inlined_call_operand.vmem [shape: f32[8,32,4], index: 1, kind: input, shape index: {}]   ;;  %s1170_s2 = inlined_call_operand.vmem [shape: f32[8,32,4], index: 2, kind: input, shape index: {}]   ;;  %s1171_s3 = inlined_call_operand.vmem [shape: f32[8,32,4], index: 3, kind: input, shape index: {}]   ;;  %s1172_s4 = inlined_call_operand.vmem [shape: f32[8,4,32], index: 4, kind: input, shape index: {}]   ;;  %s1173_s5 = inlined_call_operand.vmem [shape: f32[1,32], index: 5, kind: input, shape index: {}]   ;;  %s1174_s6 = inlined_call_operand.hbm [shape: f32[2,16,32], index: 6, kind: output, shape index: {}]  }
   0x1   :  { %13 = vsyncpa [#allocation4 + $0x1], 0  ;;  %s982_s21 = smov 0   ;;  %s984_s22 = smov 0  }
   0x2   :  { %s986_s23 = smov 0   ;;  %s988_s24 = smov 0  }
   0x3   :  { %s990_s25 = smov 0   ;;  %s992_s26 = smov 0  }
   0x4   :  { %s994_s27 = smov 0   ;;  %s996_s28 = smov 0  }
   0x5 LB: > { %1181 = sst [smem:[#allocation6_spill]] %s922_s23  ;;  %s715_s29 = sadd.s32 4294967295, %s942_s28   ;;  %s942_s28 = sphi %s996_s28, %s19_s28   ;;  %s938_s27 = sphi %s994_s27, %s1197_s27   ;;  %s934_s26 = sphi %s992_s26, %s1196_s26   ;;  %s930_s25 = sphi %s990_s25, %s1195_s25   ;;  %s926_s24 = sphi %s988_s24, %s1200_s24   ;;  %s922_s23 = sphi %s986_s23, %s1193_s23   ;;  %s918_s22 = sphi %s984_s22, %s1199_s22   ;;  %s914_s21 = sphi %s982_s21, %s1198_s21  }
   0x6   : > { %1182 = sst [smem:[#allocation7_spill]] %s934_s26  ;;  %s716_s30 = sadd.s32 4294967294, %s942_s28  }
   0x7   : > { %1183 = sst [smem:[#allocation8_spill]] %s938_s27  ;;  %s28_s7 = sadd.s32 1, %s934_s26 }
   0x8   : > { %p29_p0 = scmp.ge.s32.totalorder %s28_s7, 8  ;;  %s31_s8 = sadd.s32 1, %s938_s27 }
   0x9   : > { %p199_p1 = scmp.ne.s32.totalorder %s922_s23, %s918_s22  ;;  %p200_p2 = scmp.eq.s32.totalorder %s715_s29, 15 }
   0xa   : > { %s1202_s7 = smov (%p29_p0, %s28_s7), 0  ;;  %s1204_s8 = smov (!%p29_p0, %s31_s8), %s938_s27 }
   0xb   : > { %1184 = sst [smem:[#allocation9_spill]] %s1202_s7  ;;  %p1031_p3 = por %p200_p2, %p199_p1 }
   0xc   : > { %p205_p4 = scmp.ne.s32.totalorder %s918_s22, %s914_s21  ;;  %p33_p5 = scmp.ge.s32.totalorder %s1204_s8, 2 }
   0xd   : > { %p206_p6 = scmp.eq.s32.totalorder %s716_s30, 15  ;;  %p719_p7 = scmp.ge.s32.totalorder %s942_s28, 1 }
   0xe   : > { %p266_p8 = scmp.lt.s32.totalorder %s942_s28, 17  ;;  %s1206_s8 = smov (%p33_p5, %s1204_s8), 0 }
   0xf   : > { %1186 = sst [smem:[#allocation10_spill]] %s1206_s8  ;;  %p1041_p9 = por %p206_p6, %p205_p4 }
  0x10   : > { %p267_p10 = pnand %p719_p7, %p266_p8  ;;  %s186_s11 = ssub.s32 %s938_s27, %s1206_s8 }
  0x11   : > { %s1187_s10 = scalar_select %p1041_p9, 1, 0 }
  0x12   : > { %s189_s12 = sadd.s32 1, %s922_s23  ;;  %p187_p11 = scmp.eq.s32.totalorder %s186_s11, 0 }
  0x13   : > { %1188 = sst [smem:[#allocation11_spill]] %s1187_s10  ;;  %270 = sbr.rel (%p267_p10) target bundleno = 860 (0x35c), region = 44 }
  0x14   : > { %s1049_s13 = scalar_select %p187_p11, %s922_s23, %s189_s12  }
  0x15   : > { %s1178_s14 = sand.u32 (!%p267_p10), 1, %s918_s22   ;;  %p315_p12 = scmp.lt.s32.totalorder (!%p267_p10), %s930_s25, 1 }
  0x16   : > { %1189 = sst [smem:[#allocation12_spill]] %s1049_s13  ;;  %s720_s15 = sshll.u32 (!%p267_p10), %s1178_s14, 4 }
  0x17   : > { %p320_p13 = scmp.lt.s32.totalorder (!%p267_p10), %s926_s24, 7  ;;  %s1081_s20 = scalar_lea.vmem (!%p267_p10), [#allocation3], %s720_s15 }
  0x18   : > { %s316_s16 = scalar_select %p315_p12, %s930_s25, 1 }
  0x19   : > { %s321_s17 = scalar_select %p320_p13, %s926_s24, 7 }
  0x1a   : > { %s752_s18 = sshll.u32 %s316_s16, 4  ;;  %p730_p0 = scmp.ne.s32.totalorder %s926_s24, 0 }
  0x1b   : > { %s1061_s29 = scalar_lea.vmem %s1168_s0, %s752_s18  ;;  %s753_s30 = sshll.u32 %s321_s17, 5 }
  0x1c   : > { %s1066_s8 = scalar_lea.vmem %s1169_s1, %s753_s30  ;;  %s329_s26 = scalar_lea.vmem %s1170_s2, %s753_s30 }
  0x1d   : > { %s1074_s23 = scalar_lea.vmem %s1171_s3, %s753_s30  ;;  %s729_s16 = sshll.u32 %s321_s17, 2 }
  0x1e   : > { %s1079_s18 = scalar_lea.vmem %s1172_s4, %s729_s16  ;;  %342 = sbr.rel (%p730_p0) target bundleno = 38 (0x26), region = 48 }
  0x23   : > { %vm343_vm0 = vcmask 261120   ;;  %v944_v0 = vmov 0.0  }
  0x24   : > { %344 = vst.msk [vmem:[#allocation2] sm:$0xff] %vm343_vm0, %v944_v0 }
  0x25   : > { %345 = vst.msk [vmem:[#allocation2 + $0x8] sm:$0xff] %vm343_vm0, %v944_v0 }
  0x26 PF: > { %v355_v1 = vld [vmem:[%s329_s26 + $0x18] sm:$0xff]  ;;  %v354_v2 = vld [vmem:[%s329_s26 + $0x10] sm:$0xff]  ;;  %v353_v4 = vld [vmem:[%s329_s26 + $0x8] sm:$0xff]  ;;  %vm361_vm1 = vcmask 261120   ;;  %vm437_vm2 = vcmask 31744   ;;  %vm473_vm3 = vcmask 130048  }
  0x27   : > { %761 = vmatpush.msra.mxu3 %v355_v1  ;;  %403 = vmatpush.msra.mxu1 %v355_v1  ;;  %v351_v3 = vld [vmem:[%s1066_s8 + $0x18] sm:$0xff]  ;;  %v350_v5 = vld [vmem:[%s1066_s8 + $0x10] sm:$0xff]  ;;  %v349_v6 = vld [vmem:[%s1066_s8 + $0x8] sm:$0xff]  ;;  %vm533_vm4 = vcmask 1043456   ;;  %p746_p1 = scmp.ne.s32.totalorder %s926_s24, 7 }
  0x28   : > { %380 = vmatpush.msra.mxu0 %v351_v3  ;;  %757 = vmatpush.msra.mxu2 %v351_v3  ;;  %v352_v7 = vld [vmem:[%s329_s26] sm:$0xff]  ;;  %v347_v8 = vld [vmem:[%s1061_s29 + $0x8] sm:$0xff]  ;;  %v359_v15 = vld [vmem:[%s1074_s23 + $0x18] sm:$0xff] }
  0x29   : > { %762 = vmatpush.msra.mxu3 %v354_v2  ;;  %404 = vmatpush.msra.mxu1 %v354_v2  ;;  %v346_v9 = vld [vmem:[%s1061_s29] sm:$0xff]  ;;  %v358_v16 = vld [vmem:[%s1074_s23 + $0x10] sm:$0xff]  ;;  %v357_v17 = vld [vmem:[%s1074_s23 + $0x8] sm:$0xff] }
  0x2a   : > { %381 = vmatpush.msra.mxu0 %v350_v5  ;;  %758 = vmatpush.msra.mxu2 %v350_v5  ;;  %v348_v10 = vld [vmem:[%s1066_s8] sm:$0xff] }
  0x2b   : > { %763 = vmatpush.msra.mxu3 %v353_v4  ;;  %405 = vmatpush.msra.mxu1 %v353_v4  ;;  %v356_v18 = vld [vmem:[%s1074_s23] sm:$0xff] }
  0x2c   : > { %382 = vmatpush.msra.mxu0 %v349_v6  ;;  %759 = vmatpush.msra.mxu2 %v349_v6  ;;  %v360_v35 = vld [vmem:[%s1079_s18] sm:$0xf]  ;;  %v526_v47 = vld [vmem:[#allocation2 + $0x8] sm:$0xff] }
  0x2d   : > { %764 = vmatpush.msra.mxu3 %v352_v7  ;;  %406 = vmatpush.msra.mxu1 %v352_v7  ;;  %v525_v44 = vld [vmem:[#allocation2] sm:$0xff] }
  0x2e   : > { %734 = vmatmul.msk.f32.vlgmr.msra.gmra.mxu3 %vm361_vm1, %v347_v8  ;;  %733 = vmatmul.msk.f32.vlgmr.msra.gmra.mxu1 %vm361_vm1, %v346_v9 }
  0x2f   : > { %383 = vmatpush.msra.mxu0 %v348_v10  ;;  %760 = vmatpush.msra.mxu2 %v348_v10 }
  0x30   : > { %731 = vmatmul.msk.f32.vlgmr.msra.gmra.mxu0 %vm361_vm1, %v346_v9  ;;  %732 = vmatmul.msk.f32.vlgmr.msra.gmra.mxu2 %vm361_vm1, %v347_v8 }
  0x31   : > { %426 = vmatpush.msrb.mxu2 %v359_v15  ;;  %743 = vmatpush.msk.msrb.mxu1 %vm533_vm4, %v360_v35 }
  0x33   : > { %427 = vmatpush.msrb.mxu2 %v358_v16 }
  0x35   : > { %428 = vmatpush.msrb.mxu2 %v357_v17 }
  0x37   : > { %429 = vmatpush.msrb.mxu2 %v356_v18 }
  0x38   : > { %735 = vmatmul.msk.f32.vlgmr.msrb.gmra.mxu2 %vm361_vm1, %v346_v9 }
  0x40   : > { %736 = vmatmul.msk.f32.gmra.mxu2 %vm361_vm1, %v347_v8 }
  0xab   : > { %v408_v12 = vpop.f32.mrf.mxu1 }
  0xad   : > { %v385_v13 = vpop.f32.mrf.mxu0 }
  0xb1   : > { %v411_v11 = vpop.f32.mrf.mxu3 }
  0xb2   : > { %737 = vmatpush.xpose.msk.msrb.mxu3 %vm437_vm2, %v411_v11 }
  0xb3   : > { %v388_v14 = vpop.f32.mrf.mxu2 }
  0xb6   : > { %738 = vmatpush.xpose.msk.msrb.mxu3 %vm437_vm2, %v408_v12 }
  0xb9   : > { %739 = vmatmul.msk.f32.vlgmr.msrb.gmra.mxu3 %vm437_vm2, %v385_v13 }
  0xbb   : > { %v431_v24 = vpop.f32.mrf.mxu2 }
  0xc1   : > { %740 = vmatmul.msk.f32.gmra.mxu3 %vm437_vm2, %v388_v14 }
  0xc3   : > { %v434_v28 = vpop.f32.mrf.mxu2 }
  0xc4   : > { %516 = vmatpush.msrb.mxu0 %v434_v28 }
  0xc6   : > { %517 = vmatpush.msrb.mxu0 %v431_v24 }
 0x13c   : > { %v467_v19 = vpop.f32.mrf.mxu3 }
 0x13d   : > { %v474_v20 = vsel %vm473_vm3, %v467_v19, -inf }
 0x13e   : > { %475 = vmax.xlane.f32.xlu0 %v474_v20 }
 0x144   : > { %v470_v21 = vpop.f32.mrf.mxu3 }
 0x145   : > { %v477_v22 = vsel %vm473_vm3, %v470_v21, -inf }
 0x146   : > { %478 = vmax.xlane.f32.xlu0 %v477_v22 }
 0x1b1   : > { %v476_v23 = vpop.xlane.xlu0 %475 }
 0x1b2   : > { %v480_v25 = vsub.f32 %v467_v19, %v476_v23 }
 0x1b4   : > { %v482_v26 = vmul.f32 1.442695, %v480_v25 }
 0x1b6   : > { %839 = vpow2.f32 %v482_v26 }
 0x1b9   : > { %v479_v27 = vpop.xlane.xlu0 %478 }
 0x1ba   : > { %v481_v29 = vsub.f32 %v470_v21, %v479_v27 }
 0x1bc   : > { %v840_v30 = vpop.eup %839  ;;  %v484_v31 = vmul.f32 1.442695, %v481_v29 }
 0x1bd   : > { %v486_v32 = vsel %vm473_vm3, %v840_v30, 0.0 }
 0x1be   : > { %841 = vpow2.f32 %v484_v31  ;;  %487 = vadd.xlane.f32.xlu1 %v486_v32 }
 0x1c4   : > { %v842_v33 = vpop.eup %841 }
 0x1c5   : > { %v489_v34 = vsel %vm473_vm3, %v842_v33, 0.0 }
 0x1c6   : > { %490 = vadd.xlane.f32.xlu1 %v489_v34 }
 0x231   : > { %v488_v36 = vpop.xlane.xlu1 %487 }
 0x232   : > { %843 = vrcp.f32 %v488_v36 }
 0x238   : > { %v844_v37 = vpop.eup %843 }
 0x239   : > { %v491_v38 = vpop.xlane.xlu1 %490  ;;  %v494_v39 = vmul.f32 %v844_v37, %v840_v30 }
 0x23a   : > { %845 = vrcp.f32 %v491_v38 }
 0x23b   : > { %741 = vmatmul.msk.f32.vlgmr.msrb.gmra.mxu0 %vm473_vm3, %v494_v39 }
 0x240   : > { %v846_v40 = vpop.eup %845 }
 0x241   : > { %v495_v41 = vmul.f32 %v846_v40, %v842_v33 }
 0x243   : > { %742 = vmatmul.msk.f32.gmra.mxu0 %vm473_vm3, %v495_v41 }
 0x2b8   : > { %v519_v42 = vpop.f32.mrf.mxu0 }
 0x2b9   : > { %744 = vmatmul.msk.f32.vlgmr.msrb.gmra.mxu1 %vm437_vm2, %v519_v42 }
 0x2c0   : > { %v522_v43 = vpop.f32.mrf.mxu0 }
 0x2c1   : > { %745 = vmatmul.msk.f32.gmra.mxu1 %vm437_vm2, %v522_v43 }
 0x336   : > { %v554_v45 = vpop.f32.mrf.mxu1 }
 0x337   : > { %v560_v46 = vadd.f32 %v554_v45, %v525_v44 }
 0x339   : > { %562 = vst.msk [vmem:[#allocation2] sm:$0xff] %vm361_vm1, %v560_v46 }
 0x33d   : > { %567 = sbr.rel (%p746_p1) target bundleno = 844 (0x34c), region = 52 }
 0x33e   : > { %v557_v48 = vpop.f32.mrf.mxu1 }
 0x33f   : > { %v561_v49 = vadd.f32 %v557_v48, %v526_v47 }
 0x341   : > { %563 = vst.msk [vmem:[#allocation2 + $0x8] sm:$0xff] %vm361_vm1, %v561_v49 }
 0x342   : > { %v568_v50 = vld [vmem:[#allocation2] sm:$0xff] }
 0x343   : > { %v847_v51 = vld [vmem:[%s1173_s5] ss:$0 sm:$0xff] }
 0x344   : > { %v574_v53 = vadd.f32 %v847_v51, %v568_v50 }
 0x346   : > { %576 = vst.msk [vmem:[%s1081_s20] sm:$0xff] %vm361_vm1, %v574_v53 }
 0x348   : > { %v569_v52 = vld [vmem:[#allocation2 + $0x8] sm:$0xff] }
 0x349   : > { %v575_v54 = vadd.f32 %v847_v51, %v569_v52 }
 0x34b   : > { %577 = vst.msk [vmem:[%s1081_s20 + $0x8] sm:$0xff] %vm361_vm1, %v575_v54 }
 0x34c PF: > { %s756_s24 = sshll.u32 %s930_s25, 4  ;;  %s591_s10 = sshll.u32 %s1081_s20, 4  ;;  %s592_s10 = int_to_ptr.vmem [resolvable:$true] %s591_s10 }
 0x34d   : > { %s590_s8 = scalar_lea.hbm %s1174_s6, %s756_s24  ;;  %s1190_s14 = sand.u32 1, %s918_s22  }
 0x34e   : > { %s593_s13 = sshll.u32 %s590_s8, 4  ;;  %s579_s15 = scalar_lea.sflag [#allocation4], %s1190_s14  ;;  %s594_s13 = int_to_ptr.hbm [resolvable:$true] %s593_s13 }
 0x34f   : > { %s862_s17 = sshra.s32 %s594_s13, 4  ;;  %s868_s25 = scalar_lea.hbm %s1174_s6, 32  ;;  %s863_s17 = int_to_ptr.hbm [resolvable:$true] %s862_s17 }
 0x350   : > { %s864_s29 = scalar_lea.hbm %s863_s17, 16  ;;  %p869_p6 = scmp.lt.s32.totalorder %s863_s17, %s1174_s6 }
 0x351   : > { %p865_p2 = scmp.ne.s32.totalorder %s863_s17, %s864_s29  ;;  %p870_p7 = scmp.lt.s32.totalorder %s868_s25, %s864_s29 }
 0x353   : > { %p866_p4 = pnand %p865_p2, %p1031_p3  ;;  %p871_p8 = por %p870_p7, %p869_p6 }
 0x355   : > { %p867_p5 = pneg %p866_p4 }
 0x357   : > { %p872_p10 = pnand %p871_p8, %p867_p5 }
 0x359   : > { %875 = shalt.err (!%p872_p10)
}
 0x35a   : > { %s945_s19 = smov 128   ;;  %s946_s18 = smov 8  }
 0x35b   : > { %765 = dma.vmem_to_hbm [thread:$0]  (%p1031_p3), %s592_s10, 256, %s594_s13, %s579_s15, %s945_s19, %s945_s19, %s946_s18  }
 0x35c PF: > { %p771_p11 = scmp.ge.s32.totalorder %s942_s28, 2  ;;  %s608_s23 = sand.u32 1, %s914_s21  }
 0x35d   : > { %s609_s26 = scalar_lea.sflag [#allocation4], %s608_s23 }
 0x35e   : > { %p768_p12 = pnand %p771_p11, %p1041_p9 }
 0x360   : > { %p769_p13 = pneg %p768_p12 }
 0x362   : > { %909 = dma.done.wait (%p769_p13), %s609_s26, 256  }
 0x363   : > { %911 = vsyncadd (%p769_p13), %s609_s26, 4294967040  ;;  %s19_s28 = sadd.s32 1, %s942_s28   ;;  %s1192_s24 = sld [smem:[#allocation6_spill]] }
 0x364   : > { %p16_p0 = scmp.ge.s32.totalorder %s19_s28, 18   ;;  %s1193_s23 = sld [smem:[#allocation12_spill]] }
 0x365   : > { %s1194_s9 = sld [smem:[#allocation7_spill]]  ;;  %s1198_s21 = smov %s918_s22 }
 0x366   : > { %s1195_s25 = sld [smem:[#allocation8_spill]] }
 0x367   : > { %s1196_s26 = sld [smem:[#allocation9_spill]]  ;;  %18 = sbr.rel (!%p16_p0) target bundleno = 5 (0x5), region = 99 }
 0x368   : > { %s1197_s27 = sld [smem:[#allocation10_spill]] }
 0x369   : > { %s1199_s22 = smov %s1192_s24 }
 0x36b   : > { %s1200_s24 = smov %s1194_s9 }
 0x36c   :  { %615 = vsyncpa [#allocation4], 1 }
 0x36d   :  { %617 = vsyncpa [#allocation4 + $0x1], 1 }

</bundles_post_ra>
